<compile_context>
chip_gen: v7x
topology: tpu7x:2x2x1
jax: 0.10.0
libtpu: 0.0.40
codegen_flags: <defaults>
</compile_context>

<pallas_src>
import jax
import jax.numpy as jnp
from jax.experimental import pallas as pl
from jax.experimental.pallas import tpu as pltpu

LANE = 128


def _round_up(n, m):
    return ((n + m - 1) // m) * m


def _pad_axis(a, axis, target):
    pad = target - a.shape[axis]
    if pad <= 0:
        return a
    widths = [(0, 0)] * a.ndim
    widths[axis] = (0, pad)
    return jnp.pad(a, widths)


def _make_kernel(n_hidden):
    def kernel(*refs):
        # refs = x, (W, b) * n_hidden, We, be, Wn, bn, edges_out, nodes_out
        h = refs[0][...].astype(jnp.float32)
        idx = 1
        for _ in range(n_hidden):
            w = refs[idx][...]
            b = refs[idx + 1][...]
            idx += 2
            # Linear -> Tanh. (Dropout is identity in inference mode.)
            h = jnp.tanh(jnp.dot(h, w, preferred_element_type=jnp.float32) + b)
        we = refs[idx][...]
        be = refs[idx + 1][...]
        wn = refs[idx + 2][...]
        bn = refs[idx + 3][...]
        e_ref = refs[idx + 4]
        n_ref = refs[idx + 5]
        # Symmetrization + output permute are already folded into we/be.
        e_ref[...] = (jnp.dot(h, we, preferred_element_type=jnp.float32) + be
                      ).astype(e_ref.dtype)
        n_ref[...] = (jnp.dot(h, wn, preferred_element_type=jnp.float32) + bn
                      ).astype(n_ref.dtype)
    return kernel


def generator_forward(x, params, *, vertexes, edges, nodes, batch_tile=512):
    """Forward pass of Generator (dropout in eval mode).

    Returns (edges_logits (B, V, V, E), nodes_logits (B, V, N)).
    """
    V, E, N = vertexes, edges, nodes
    B, z_dim = x.shape
    hidden = params["hidden"]                # list of (W (in, out), b (out,))
    we, be = params["we"], params["be"]      # (H, E*V*V), (E*V*V,)
    wn, bn = params["wn"], params["bn"]      # (H, V*N),   (V*N,)

    # ---- fold (e + e^T)/2 and the (0,2,3,1) permute into the edge head ----
    H = we.shape[0]
    we4 = we.reshape(H, E, V, V)
    we4 = (we4 + jnp.swapaxes(we4, -1, -2)) * 0.5
    we_f = jnp.transpose(we4, (0, 2, 3, 1)).reshape(H, V * V * E)
    be4 = be.reshape(E, V, V)
    be4 = (be4 + jnp.swapaxes(be4, -1, -2)) * 0.5
    be_f = jnp.transpose(be4, (1, 2, 0)).reshape(1, V * V * E)

    # ---- zero-pad feature dims to multiples of 128 (lane-dense) ----
    prev = z_dim
    ws, bs = [], []
    for (w, b) in hidden:
        out_p = _round_up(w.shape[1], LANE)
        ws.append(_pad_axis(_pad_axis(w, 0, prev), 1, out_p))
        bs.append(_pad_axis(b.reshape(1, -1), 1, out_p))
        prev = out_p
    de = _round_up(V * V * E, LANE)
    dn = _round_up(V * N, LANE)
    we_f = _pad_axis(_pad_axis(we_f, 0, prev), 1, de)
    be_f = _pad_axis(be_f, 1, de)
    wn_f = _pad_axis(_pad_axis(wn, 0, prev), 1, dn)
    bn_f = _pad_axis(bn.reshape(1, -1), 1, dn)

    # ---- batch tiling (grid over B, weights resident across the grid) ----
    if B > batch_tile:
        TB = batch_tile                      # multiple of 8
        B_pad = _round_up(B, TB)
    else:
        TB = B                               # full-extent block
        B_pad = B
    x_p = _pad_axis(x, 0, B_pad)
    grid = (B_pad // TB,)

    def tiled(shape):
        return pl.BlockSpec((TB, shape[1]), lambda i: (i, 0))

    def resident(shape):
        return pl.BlockSpec(shape, lambda i, _n=len(shape): (0,) * _n)

    in_arrays = [x_p]
    in_specs = [tiled(x_p.shape)]
    for w, b in zip(ws, bs):
        in_arrays += [w, b]
        in_specs += [resident(w.shape), resident(b.shape)]
    in_arrays += [we_f, be_f, wn_f, bn_f]
    in_specs += [resident(we_f.shape), resident(be_f.shape),
                 resident(wn_f.shape), resident(bn_f.shape)]

    out_shape = (jax.ShapeDtypeStruct((B_pad, de), x.dtype),
                 jax.ShapeDtypeStruct((B_pad, dn), x.dtype))
    out_specs = (pl.BlockSpec((TB, de), lambda i: (i, 0)),
                 pl.BlockSpec((TB, dn), lambda i: (i, 0)))

    edges_flat, nodes_flat = pl.pallas_call(
        _make_kernel(len(ws)),
        out_shape=out_shape,
        grid=grid,
        in_specs=in_specs,
        out_specs=out_specs,
        compiler_params=pltpu.CompilerParams(
            dimension_semantics=("parallel",)),
    )(*in_arrays)

    edges_logits = edges_flat[:B, :V * V * E].reshape(B, V, V, E)
    nodes_logits = nodes_flat[:B, :V * N].reshape(B, V, N)
    return edges_logits, nodes_logits


def init_params(key, z_dim, conv_dims, vertexes, edges, nodes):
    """PyTorch-style Linear init. Weights stored pre-transposed as (in, out)."""
    dims = [z_dim] + list(conv_dims)
    n_lin = len(conv_dims) + 2
    ks = jax.random.split(key, 2 * n_lin)

    def lin(kw, kb, fi, fo):
        bound = 1.0 / jnp.sqrt(fi)
        w = jax.random.uniform(kw, (fi, fo), jnp.float32, -bound, bound)
        b = jax.random.uniform(kb, (fo,), jnp.float32, -bound, bound)
        return w, b

    hidden = []
    ki = 0
    for c0, c1 in zip(dims[:-1], dims[1:]):
        w, b = lin(ks[ki], ks[ki + 1], c0, c1)
        ki += 2
        hidden.append((w, b))
    we, be = lin(ks[ki], ks[ki + 1], conv_dims[-1], edges * vertexes * vertexes)
    wn, bn = lin(ks[ki + 2], ks[ki + 3], conv_dims[-1], vertexes * nodes)
    return dict(hidden=hidden, we=we, be=be, wn=wn, bn=bn)


def reference_forward(x, params, *, vertexes, edges, nodes):
    """Pure-JAX reference with identical (eval-mode) semantics."""
    V, E, N = vertexes, edges, nodes
    h = x
    for w, b in params["hidden"]:
        h = jnp.tanh(h @ w + b)              # Dropout = identity (eval)
    e = (h @ params["we"] + params["be"]).reshape(-1, E, V, V)
    e = (e + jnp.swapaxes(e, -1, -2)) * 0.5
    e = jnp.transpose(e, (0, 2, 3, 1))       # (B, V, V, E)
    n = (h @ params["wn"] + params["bn"]).reshape(-1, V, N)
    return e, n


if __name__ == "__main__":
    key = jax.random.PRNGKey(0)
    k_x, k_p = jax.random.split(key)

    batch, z_dim = 2, 8
    conv_dims = (64, 128)
    vertexes, edges, nodes = 8, 4, 4

    x = jax.random.normal(k_x, (batch, z_dim), jnp.float32)
    params = init_params(k_p, z_dim, conv_dims, vertexes, edges, nodes)

    e_out, n_out = generator_forward(
        x, params, vertexes=vertexes, edges=edges, nodes=nodes)
    e_out = jax.block_until_ready(e_out)
    n_out = jax.block_until_ready(n_out)

    e_ref, n_ref = reference_forward(
        x, params, vertexes=vertexes, edges=edges, nodes=nodes)

    assert e_out.shape == (batch, vertexes, vertexes, edges)
    assert n_out.shape == (batch, vertexes, nodes)
    assert jnp.allclose(e_out, e_ref, atol=1e-4, rtol=1e-4), "edges mismatch"
    assert jnp.allclose(n_out, n_ref, atol=1e-4, rtol=1e-4), "nodes mismatch"
    # The symmetrization fold must yield symmetric edge logits.
    assert jnp.allclose(e_out, jnp.swapaxes(e_out, 1, 2), atol=1e-5)

    print("KERNEL_OK")
</pallas_src>

<mosaic_0001>
module attributes {stable_mosaic.version = 11 : i64} {
  func.func @kernel(%arg0: i32, %arg1: memref<2x8xf32, #tpu.memory_space<vmem>>, %arg2: memref<8x128xf32, #tpu.memory_space<vmem>>, %arg3: memref<1x128xf32, #tpu.memory_space<vmem>>, %arg4: memref<128x128xf32, #tpu.memory_space<vmem>>, %arg5: memref<1x128xf32, #tpu.memory_space<vmem>>, %arg6: memref<128x256xf32, #tpu.memory_space<vmem>>, %arg7: memref<1x256xf32, #tpu.memory_space<vmem>>, %arg8: memref<128x128xf32, #tpu.memory_space<vmem>>, %arg9: memref<1x128xf32, #tpu.memory_space<vmem>>, %arg10: memref<2x256xf32, #tpu.memory_space<vmem>>, %arg11: memref<2x128xf32, #tpu.memory_space<vmem>>) attributes {dimension_semantics = [#tpu.dimension_semantics<parallel>], iteration_bounds = array<i64: 1>, scalar_prefetch = 0 : i64, scratch_operands = 0 : i64, tpu.core_type = #tpu.core_type<tc>, window_params = [{transform_indices = @transform_0, window_bounds = array<i64: 2, 8>}, {pipeline_mode = #tpu.pipeline_mode<synchronous>, transform_indices = @transform_1, window_bounds = array<i64: 8, 128>}, {pipeline_mode = #tpu.pipeline_mode<synchronous>, transform_indices = @transform_2, window_bounds = array<i64: 1, 128>}, {pipeline_mode = #tpu.pipeline_mode<synchronous>, transform_indices = @transform_3, window_bounds = array<i64: 128, 128>}, {pipeline_mode = #tpu.pipeline_mode<synchronous>, transform_indices = @transform_4, window_bounds = array<i64: 1, 128>}, {pipeline_mode = #tpu.pipeline_mode<synchronous>, transform_indices = @transform_5, window_bounds = array<i64: 128, 256>}, {pipeline_mode = #tpu.pipeline_mode<synchronous>, transform_indices = @transform_6, window_bounds = array<i64: 1, 256>}, {pipeline_mode = #tpu.pipeline_mode<synchronous>, transform_indices = @transform_7, window_bounds = array<i64: 128, 128>}, {pipeline_mode = #tpu.pipeline_mode<synchronous>, transform_indices = @transform_8, window_bounds = array<i64: 1, 128>}, {transform_indices = @transform_9, window_bounds = array<i64: 2, 256>}, {transform_indices = @transform_10, window_bounds = array<i64: 2, 128>}]} {
    %c0 = arith.constant 0 : index
    %c0_0 = arith.constant 0 : index
    %0 = vector.load %arg1[%c0, %c0_0] : memref<2x8xf32, #tpu.memory_space<vmem>>, vector<2x8xf32>
    %c0_1 = arith.constant 0 : index
    %c0_2 = arith.constant 0 : index
    %1 = vector.load %arg2[%c0_1, %c0_2] : memref<8x128xf32, #tpu.memory_space<vmem>>, vector<8x128xf32>
    %c0_3 = arith.constant 0 : index
    %c0_4 = arith.constant 0 : index
    %2 = vector.load %arg3[%c0_3, %c0_4] : memref<1x128xf32, #tpu.memory_space<vmem>>, vector<1x128xf32>
    %cst = arith.constant dense<0.000000e+00> : vector<2x128xf32>
    %3 = tpu.matmul %0, %1, %cst {dimension_numbers = #tpu.dot_dimension_numbers<[1], [0], [0], [1], [0, 0, 1, 1], [], []>} : vector<2x8xf32>, vector<8x128xf32>, vector<2x128xf32> -> vector<2x128xf32>
    %4 = vector.broadcast %2 : vector<1x128xf32> to vector<2x128xf32>
    %5 = arith.addf %3, %4 : vector<2x128xf32>
    %6 = math.tanh %5 : vector<2x128xf32>
    %c0_5 = arith.constant 0 : index
    %c0_6 = arith.constant 0 : index
    %7 = vector.load %arg4[%c0_5, %c0_6] : memref<128x128xf32, #tpu.memory_space<vmem>>, vector<128x128xf32>
    %c0_7 = arith.constant 0 : index
    %c0_8 = arith.constant 0 : index
    %8 = vector.load %arg5[%c0_7, %c0_8] : memref<1x128xf32, #tpu.memory_space<vmem>>, vector<1x128xf32>
    %cst_9 = arith.constant dense<0.000000e+00> : vector<2x128xf32>
    %9 = tpu.matmul %6, %7, %cst_9 {dimension_numbers = #tpu.dot_dimension_numbers<[1], [0], [0], [1], [0, 0, 1, 1], [], []>} : vector<2x128xf32>, vector<128x128xf32>, vector<2x128xf32> -> vector<2x128xf32>
    %10 = vector.broadcast %8 : vector<1x128xf32> to vector<2x128xf32>
    %11 = arith.addf %9, %10 : vector<2x128xf32>
    %12 = math.tanh %11 : vector<2x128xf32>
    %c0_10 = arith.constant 0 : index
    %c0_11 = arith.constant 0 : index
    %13 = vector.load %arg6[%c0_10, %c0_11] : memref<128x256xf32, #tpu.memory_space<vmem>>, vector<128x256xf32>
    %c0_12 = arith.constant 0 : index
    %c0_13 = arith.constant 0 : index
    %14 = vector.load %arg7[%c0_12, %c0_13] : memref<1x256xf32, #tpu.memory_space<vmem>>, vector<1x256xf32>
    %c0_14 = arith.constant 0 : index
    %c0_15 = arith.constant 0 : index
    %15 = vector.load %arg8[%c0_14, %c0_15] : memref<128x128xf32, #tpu.memory_space<vmem>>, vector<128x128xf32>
    %c0_16 = arith.constant 0 : index
    %c0_17 = arith.constant 0 : index
    %16 = vector.load %arg9[%c0_16, %c0_17] : memref<1x128xf32, #tpu.memory_space<vmem>>, vector<1x128xf32>
    %cst_18 = arith.constant dense<0.000000e+00> : vector<2x256xf32>
    %17 = tpu.matmul %12, %13, %cst_18 {dimension_numbers = #tpu.dot_dimension_numbers<[1], [0], [0], [1], [0, 0, 1, 1], [], []>} : vector<2x128xf32>, vector<128x256xf32>, vector<2x256xf32> -> vector<2x256xf32>
    %18 = vector.broadcast %14 : vector<1x256xf32> to vector<2x256xf32>
    %19 = arith.addf %17, %18 : vector<2x256xf32>
    %c0_19 = arith.constant 0 : index
    %c0_20 = arith.constant 0 : index
    %20 = vector.load %arg10[%c0_19, %c0_20] : memref<2x256xf32, #tpu.memory_space<vmem>>, vector<2x256xf32>
    tpu.vector_store %arg10[%c0_19, %c0_20], %19 {strides = array<i32>} : memref<2x256xf32, #tpu.memory_space<vmem>>, vector<2x256xf32>,
    %cst_21 = arith.constant dense<0.000000e+00> : vector<2x128xf32>
    %21 = tpu.matmul %12, %15, %cst_21 {dimension_numbers = #tpu.dot_dimension_numbers<[1], [0], [0], [1], [0, 0, 1, 1], [], []>} : vector<2x128xf32>, vector<128x128xf32>, vector<2x128xf32> -> vector<2x128xf32>
    %22 = vector.broadcast %16 : vector<1x128xf32> to vector<2x128xf32>
    %23 = arith.addf %21, %22 : vector<2x128xf32>
    %c0_22 = arith.constant 0 : index
    %c0_23 = arith.constant 0 : index
    %24 = vector.load %arg11[%c0_22, %c0_23] : memref<2x128xf32, #tpu.memory_space<vmem>>, vector<2x128xf32>
    tpu.vector_store %arg11[%c0_22, %c0_23], %23 {strides = array<i32>} : memref<2x128xf32, #tpu.memory_space<vmem>>, vector<2x128xf32>,
    return
  }
  func.func @transform_0(%arg0: i32) -> (i32, i32) {
    %c0_i32 = arith.constant 0 : i32
    %c0_i32_0 = arith.constant 0 : i32
    return %arg0, %c0_i32 : i32, i32
  }
  func.func @transform_1(%arg0: i32) -> (i32, i32) {
    %c0_i32 = arith.constant 0 : i32
    %c0_i32_0 = arith.constant 0 : i32
    %c0_i32_1 = arith.constant 0 : i32
    return %c0_i32, %c0_i32_0 : i32, i32
  }
  func.func @transform_2(%arg0: i32) -> (i32, i32) {
    %c0_i32 = arith.constant 0 : i32
    %c0_i32_0 = arith.constant 0 : i32
    %c0_i32_1 = arith.constant 0 : i32
    return %c0_i32, %c0_i32_0 : i32, i32
  }
  func.func @transform_3(%arg0: i32) -> (i32, i32) {
    %c0_i32 = arith.constant 0 : i32
    %c0_i32_0 = arith.constant 0 : i32
    %c0_i32_1 = arith.constant 0 : i32
    return %c0_i32, %c0_i32_0 : i32, i32
  }
  func.func @transform_4(%arg0: i32) -> (i32, i32) {
    %c0_i32 = arith.constant 0 : i32
    %c0_i32_0 = arith.constant 0 : i32
    %c0_i32_1 = arith.constant 0 : i32
    return %c0_i32, %c0_i32_0 : i32, i32
  }
  func.func @transform_5(%arg0: i32) -> (i32, i32) {
    %c0_i32 = arith.constant 0 : i32
    %c0_i32_0 = arith.constant 0 : i32
    %c0_i32_1 = arith.constant 0 : i32
    return %c0_i32, %c0_i32_0 : i32, i32
  }
  func.func @transform_6(%arg0: i32) -> (i32, i32) {
    %c0_i32 = arith.constant 0 : i32
    %c0_i32_0 = arith.constant 0 : i32
    %c0_i32_1 = arith.constant 0 : i32
    return %c0_i32, %c0_i32_0 : i32, i32
  }
  func.func @transform_7(%arg0: i32) -> (i32, i32) {
    %c0_i32 = arith.constant 0 : i32
    %c0_i32_0 = arith.constant 0 : i32
    %c0_i32_1 = arith.constant 0 : i32
    return %c0_i32, %c0_i32_0 : i32, i32
  }
  func.func @transform_8(%arg0: i32) -> (i32, i32) {
    %c0_i32 = arith.constant 0 : i32
    %c0_i32_0 = arith.constant 0 : i32
    %c0_i32_1 = arith.constant 0 : i32
    return %c0_i32, %c0_i32_0 : i32, i32
  }
  func.func @transform_9(%arg0: i32) -> (i32, i32) {
    %c0_i32 = arith.constant 0 : i32
    %c0_i32_0 = arith.constant 0 : i32
    return %arg0, %c0_i32 : i32, i32
  }
  func.func @transform_10(%arg0: i32) -> (i32, i32) {
    %c0_i32 = arith.constant 0 : i32
    %c0_i32_0 = arith.constant 0 : i32
    return %arg0, %c0_i32 : i32, i32
  }
}

</mosaic_0001>

<bundles_post_ra>
// kernel: tpu_custom_call.1
= control target key start
LH: loop header
LB: loop body
LE: loop exit
PB: predicated region body
PF: predicated region fallthrough
CT: control target
= control target key end

     0   :  { %16 = vsyncpa [#allocation3], 0  ;;  %s1111_s0 = inlined_call_operand.hbm [shape: f32[2,8], index: 0, kind: input, shape index: {}]   ;;  %s1112_s1 = inlined_call_operand.hbm [shape: f32[8,128], index: 1, kind: input, shape index: {}]   ;;  %s1113_s2 = inlined_call_operand.vmem [shape: f32[1,128], index: 2, kind: input, shape index: {}]   ;;  %s1114_s3 = inlined_call_operand.hbm [shape: f32[128,128], index: 3, kind: input, shape index: {}]   ;;  %s1115_s4 = inlined_call_operand.vmem [shape: f32[1,128], index: 4, kind: input, shape index: {}]   ;;  %s1116_s5 = inlined_call_operand.hbm [shape: f32[128,256], index: 5, kind: input, shape index: {}]   ;;  %s1117_s6 = inlined_call_operand.vmem [shape: f32[1,256], index: 6, kind: input, shape index: {}]   ;;  %s1118_s7 = inlined_call_operand.hbm [shape: f32[128,128], index: 7, kind: input, shape index: {}]   ;;  %s1119_s8 = inlined_call_operand.vmem [shape: f32[1,128], index: 8, kind: input, shape index: {}]   ;;  %s1120_s9 = inlined_call_operand.hbm [shape: f32[2,256], index: 9, kind: output, shape index: {0}]   ;;  %s1121_s10 = inlined_call_operand.hbm [shape: f32[2,128], index: 10, kind: output, shape index: {1}]  }
   0x1   :  { %17 = vsyncpa [#allocation6], 0 }
   0x2   :  { %18 = vsyncpa [#allocation9], 0 }
   0x3   :  { %19 = vsyncpa [#allocation4], 0 }
   0x4   :  { %20 = vsyncpa [#allocation13], 0  ;;  %s908_s13 = smov [#allocation5]   ;;  %s909_s15 = smov [#allocation8]  }
   0x5   :  { %s37_s14 = sshll.u32 %s908_s13, 4  ;;  %s62_s16 = sshll.u32 %s909_s15, 4  ;;  %s38_s14 = int_to_ptr.vmem [resolvable:$true] %s37_s14  ;;  %s977_s16 = int_to_ptr.vmem [resolvable:$true] %s62_s16 }
   0x6   :  { %s744_s19 = scalar_lea.hbm %s1112_s1, 128 }
   0x7   :  { %p745_p0 = scmp.ne.s32.totalorder %s1112_s1, %s744_s19  ;;  %p748_p1 = scmp.lt.u32.totalorder %s744_s19, %s1112_s1 }
   0x9   :  { %p750_p2 = pnand %p748_p1, %p745_p0 }
   0xb   :  { %753 = shalt.err (!%p750_p2)
}
   0xc   :  { %s754_s24 = scalar_lea.vmem %s38_s14, 128  ;;  %p759_p4 = scmp.lt.s32.totalorder %s38_s14, %s38_s14 }
   0xd   :  { %p755_p3 = scmp.ne.s32.totalorder %s38_s14, %s754_s24  ;;  %p760_p5 = scmp.lt.s32.totalorder %s754_s24, %s754_s24 }
   0xf   :  { %p761_p6 = por %p760_p5, %p759_p4 }
  0x11   :  { %p762_p7 = pnand %p761_p6, %p755_p3 }
  0x13   :  { %765 = shalt.err (!%p762_p7)
}
  0x14   :  { %40 = dma.hbm_to_vmem [thread:$0]  %s1112_s1, 128, %s38_s14, [#allocation6]  }
  0x15   :  { %s766_s29 = scalar_lea.hbm %s1116_s5, 4096 }
  0x16   :  { %p767_p8 = scmp.ne.s32.totalorder %s1116_s5, %s766_s29  ;;  %p770_p9 = scmp.lt.u32.totalorder %s766_s29, %s1116_s5 }
  0x18   :  { %p772_p10 = pnand %p770_p9, %p767_p8 }
  0x1a   :  { %775 = shalt.err (!%p772_p10)
}
  0x1b   :  { %s776_s15 = scalar_lea.vmem %s977_s16, 4096  ;;  %p781_p12 = scmp.lt.s32.totalorder %s977_s16, %s977_s16 }
  0x1c   :  { %p777_p11 = scmp.ne.s32.totalorder %s977_s16, %s776_s15  ;;  %p782_p13 = scmp.lt.s32.totalorder %s776_s15, %s776_s15 }
  0x1e   :  { %p783_p0 = por %p782_p13, %p781_p12 }
  0x20   :  { %p784_p1 = pnand %p783_p0, %p777_p11 }
  0x22   :  { %787 = shalt.err (!%p784_p1)
}
  0x23   :  { %s910_s1 = smov 256   ;;  %s911_s14 = smov 16  }
  0x24   :  { %68 = dma.hbm_to_vmem [thread:$0]  %s1116_s5, 4096, %s977_s16, [#allocation9], %s910_s1, %s910_s1, %s911_s14  }
  0x25   :  { %s912_s19 = smov [#allocation2]   ;;  %s913_s21 = smov [#allocation7]  }
  0x26   :  { %s27_s20 = sshll.u32 %s912_s19, 4  ;;  %s48_s22 = sshll.u32 %s913_s21, 4  ;;  %s28_s20 = int_to_ptr.vmem [resolvable:$true] %s27_s20  ;;  %s1008_s22 = int_to_ptr.vmem [resolvable:$true] %s48_s22 }
  0x27   :  { %s788_s25 = scalar_lea.hbm %s1111_s0, 32 }
  0x28   :  { %p789_p2 = scmp.ne.s32.totalorder %s1111_s0, %s788_s25  ;;  %p792_p3 = scmp.lt.u32.totalorder %s788_s25, %s1111_s0 }
  0x2a   :  { %p794_p4 = pnand %p792_p3, %p789_p2 }
  0x2c   :  { %797 = shalt.err (!%p794_p4)
}
  0x2d   :  { %s798_s5 = scalar_lea.vmem %s28_s20, 32  ;;  %p803_p6 = scmp.lt.s32.totalorder %s28_s20, %s28_s20 }
  0x2e   :  { %p799_p5 = scmp.ne.s32.totalorder %s28_s20, %s798_s5  ;;  %p804_p7 = scmp.lt.s32.totalorder %s798_s5, %s798_s5 }
  0x30   :  { %p805_p8 = por %p804_p7, %p803_p6 }
  0x32   :  { %p806_p9 = pnand %p805_p8, %p799_p5 }
  0x34   :  { %809 = shalt.err (!%p806_p9)
}
  0x35   :  { %30 = dma.hbm_to_vmem [thread:$0]  %s1111_s0, 32, %s28_s20, [#allocation3]  }
  0x36   :  { %s810_s13 = scalar_lea.hbm %s1114_s3, 2048 }
  0x37   :  { %p811_p10 = scmp.ne.s32.totalorder %s1114_s3, %s810_s13  ;;  %p814_p11 = scmp.lt.u32.totalorder %s810_s13, %s1114_s3 }
  0x39   :  { %p816_p12 = pnand %p814_p11, %p811_p10 }
  0x3b   :  { %819 = shalt.err (!%p816_p12)
}
  0x3c   :  { %s820_s18 = scalar_lea.vmem %s1008_s22, 2048  ;;  %p825_p0 = scmp.lt.s32.totalorder %s1008_s22, %s1008_s22 }
  0x3d   :  { %p821_p13 = scmp.ne.s32.totalorder %s1008_s22, %s820_s18  ;;  %p826_p1 = scmp.lt.s32.totalorder %s820_s18, %s820_s18 }
  0x3f   :  { %p827_p2 = por %p826_p1, %p825_p0 }
  0x41   :  { %p828_p3 = pnand %p827_p2, %p821_p13 }
  0x43   :  { %831 = shalt.err (!%p828_p3)
}
  0x44   :  { %s914_s0 = smov 128   ;;  %s915_s19 = smov 8  }
  0x45   :  { %54 = dma.hbm_to_vmem [thread:$0]  %s1114_s3, 2048, %s1008_s22, [#allocation6], %s914_s0, %s914_s0, %s915_s19  }
  0x46   :  { %s916_s23 = smov [#allocation10]   ;;  %s832_s27 = scalar_lea.hbm %s1118_s7, 2048 }
  0x47   :  { %s76_s24 = sshll.u32 %s916_s23, 4  ;;  %p833_p4 = scmp.ne.s32.totalorder %s1118_s7, %s832_s27  ;;  %s77_s24 = int_to_ptr.vmem [resolvable:$true] %s76_s24 }
  0x48   :  { %p836_p5 = scmp.lt.u32.totalorder %s832_s27, %s1118_s7 }
  0x4a   :  { %p838_p6 = pnand %p836_p5, %p833_p4 }
  0x4c   :  { %841 = shalt.err (!%p838_p6)
}
  0x4d   :  { %s842_s30 = scalar_lea.vmem %s77_s24, 2048  ;;  %p847_p8 = scmp.lt.s32.totalorder %s77_s24, %s77_s24 }
  0x4e   :  { %p843_p7 = scmp.ne.s32.totalorder %s77_s24, %s842_s30  ;;  %p848_p9 = scmp.lt.s32.totalorder %s842_s30, %s842_s30 }
  0x50   :  { %p849_p10 = por %p848_p9, %p847_p8 }
  0x52   :  { %p850_p11 = pnand %p849_p10, %p843_p7 }
  0x54   :  { %853 = shalt.err (!%p850_p11)
}
  0x55   :  { %82 = dma.hbm_to_vmem [thread:$0]  %s1118_s7, 2048, %s77_s24, [#allocation9], %s914_s0, %s914_s0, %s915_s19  }
  0x56   :  { %898 = dma.done.wait [#allocation3], 32  }
  0x57   :  { %899 = vsyncadd [#allocation3], 4294967264 }
  0x58   :  { %900 = dma.done.wait [#allocation6], 2176  }
  0x59   :  { %901 = vsyncadd [#allocation6], 4294965120 }
  0x5a   :  { %902 = dma.done.wait [#allocation9], 6144  }
  0x5b   :  { %903 = vsyncadd [#allocation9], 4294961152  ;;  %v917_v0 = vmov 0.0   ;;  %vm918_vm0 = vmmov 0   ;;  %v919_v1 = vmov 0.0|0.0   ;;  %vm109_vm1 = vcmask 64512  }
  0x5c   :  { %571 = vmatprep.subr.mxu0 %v917_v0  ;;  %573 = vmatprep.mubr.msk.f32.mxu0 %vm918_vm0, %v917_v0  ;;  %v101_v2 = vld [vmem:[#allocation5] sm:$0xff]  ;;  %v100_v3 = vld [vmem:[#allocation2] sm:$0x3]  ;;  %v184_v4 = vld [vmem:[#allocation7] sm:$0xff]  ;;  %s921_s18 = smov [#allocation11]  }
  0x5d   :  { %646 = vmatprep.subr.bf16.mxu1 %v919_v1  ;;  %608 = vmatprep.mubr.msk.f32.mxu1 %vm918_vm0, %v917_v0  ;;  %v185_v5 = vld [vmem:[#allocation7 + $0x8] sm:$0xff]  ;;  %v186_v6 = vld [vmem:[#allocation7 + $0x10] sm:$0xff]  ;;  %v187_v7 = vld [vmem:[#allocation7 + $0x18] sm:$0xff]  ;;  %s505_s0 = sshll.u32 %s921_s18, 4  ;;  %s506_s0 = int_to_ptr.vmem [resolvable:$true] %s505_s0 }
  0x5e   :  { %572 = vmatpush3.msra.mxu0 %v101_v2  ;;  %v647_v8 = vpack.c.bf16 %v185_v5, %v184_v4  ;;  %v650_v9 = vpack.c.bf16 %v187_v7, %v186_v6  ;;  %v188_v10 = vld [vmem:[#allocation7 + $0x20] sm:$0xff]  ;;  %v189_v11 = vld [vmem:[#allocation7 + $0x28] sm:$0xff]  ;;  %v190_v13 = vld [vmem:[#allocation7 + $0x30] sm:$0xff] }
  0x5f   :  { %574 = vmatmul.mubr.msk.f32.vlgmr.msra.gmra.mrb[0].mxu0 %vm109_vm1, %v100_v3  ;;  %v653_v12 = vpack.c.bf16 %v189_v11, %v188_v10  ;;  %v191_v14 = vld [vmem:[#allocation7 + $0x38] sm:$0xff]  ;;  %v192_v16 = vld [vmem:[#allocation7 + $0x40] sm:$0xff]  ;;  %v193_v17 = vld [vmem:[#allocation7 + $0x48] sm:$0xff] }
  0x60   :  { %403 = vmatprep.mubr.f32.mxu0 %v917_v0  ;;  %648 = vmatpush3.bf16.msra.mxu1 %v647_v8  ;;  %v656_v15 = vpack.c.bf16 %v191_v14, %v190_v13  ;;  %v659_v18 = vpack.c.bf16 %v193_v17, %v192_v16  ;;  %v194_v19 = vld [vmem:[#allocation7 + $0x50] sm:$0xff]  ;;  %v195_v20 = vld [vmem:[#allocation7 + $0x58] sm:$0xff]  ;;  %v196_v22 = vld [vmem:[#allocation7 + $0x60] sm:$0xff] }
  0x61   :  { %649 = vmatprep.subr.bf16.mxu1 %v919_v1  ;;  %v662_v21 = vpack.c.bf16 %v195_v20, %v194_v19  ;;  %v197_v23 = vld [vmem:[#allocation7 + $0x68] sm:$0xff]  ;;  %v198_v25 = vld [vmem:[#allocation7 + $0x70] sm:$0xff]  ;;  %v199_v26 = vld [vmem:[#allocation7 + $0x78] sm:$0xff] }
  0x62   :  { %v665_v24 = vpack.c.bf16 %v197_v23, %v196_v22  ;;  %v668_v27 = vpack.c.bf16 %v199_v26, %v198_v25  ;;  %v279_v28 = vld [vmem:[#allocation8 + $0x8] sm:$0xff]  ;;  %v281_v29 = vld [vmem:[#allocation8 + $0x18] sm:$0xff]  ;;  %v278_v30 = vld [vmem:[#allocation8] sm:$0xff] }
  0x63   :  { %v670_v31 = vpack.c.bf16 %v281_v29, %v279_v28  ;;  %v280_v32 = vld [vmem:[#allocation8 + $0x10] sm:$0xff]  ;;  %v283_v34 = vld [vmem:[#allocation8 + $0x28] sm:$0xff]  ;;  %v285_v35 = vld [vmem:[#allocation8 + $0x38] sm:$0xff] }
  0x64   :  { %651 = vmatpush3.bf16.msra.mxu1 %v650_v9  ;;  %v672_v33 = vpack.c.bf16 %v280_v32, %v278_v30  ;;  %v282_v36 = vld [vmem:[#allocation8 + $0x20] sm:$0xff]  ;;  %v674_v37 = vpack.c.bf16 %v285_v35, %v283_v34  ;;  %v284_v38 = vld [vmem:[#allocation8 + $0x30] sm:$0xff]  ;;  %v287_v40 = vld [vmem:[#allocation8 + $0x48] sm:$0xff] }
  0x65   :  { %652 = vmatprep.subr.bf16.mxu1 %v919_v1  ;;  %671 = vmatprep.subr.bf16.mxu0 %v670_v31  ;;  %v676_v39 = vpack.c.bf16 %v284_v38, %v282_v36  ;;  %v289_v41 = vld [vmem:[#allocation8 + $0x58] sm:$0xff]  ;;  %v286_v43 = vld [vmem:[#allocation8 + $0x40] sm:$0xff]  ;;  %v288_v44 = vld [vmem:[#allocation8 + $0x50] sm:$0xff] }
  0x66   :  { %673 = vmatpush1.bf16.msra.mxu0 %v672_v33  ;;  %v678_v42 = vpack.c.bf16 %v289_v41, %v287_v40  ;;  %v680_v45 = vpack.c.bf16 %v288_v44, %v286_v43  ;;  %v291_v46 = vld [vmem:[#allocation8 + $0x68] sm:$0xff]  ;;  %v293_v47 = vld [vmem:[#allocation8 + $0x78] sm:$0xff]  ;;  %v290_v49 = vld [vmem:[#allocation8 + $0x60] sm:$0xff] }
  0x67   :  { %675 = vmatprep.subr.bf16.mxu0 %v674_v37  ;;  %v682_v48 = vpack.c.bf16 %v293_v47, %v291_v46  ;;  %v292_v50 = vld [vmem:[#allocation8 + $0x70] sm:$0xff]  ;;  %v295_v52 = vld [vmem:[#allocation8 + $0x88] sm:$0xff]  ;;  %v297_v53 = vld [vmem:[#allocation8 + $0x98] sm:$0xff]  ;;  %v329_v47 = vlaneseq }
  0x68   :  { %654 = vmatpush3.bf16.msra.mxu1 %v653_v12  ;;  %v684_v51 = vpack.c.bf16 %v292_v50, %v290_v49  ;;  %v686_v54 = vpack.c.bf16 %v297_v53, %v295_v52  ;;  %v294_v55 = vld [vmem:[#allocation8 + $0x80] sm:$0xff]  ;;  %v296_v56 = vld [vmem:[#allocation8 + $0x90] sm:$0xff]  ;;  %v312_v63 = vld [vmem:[#allocation10 + $0x8] sm:$0xff] }
  0x69   :  { %655 = vmatprep.subr.bf16.mxu1 %v919_v1  ;;  %v688_v57 = vpack.c.bf16 %v296_v56, %v294_v55  ;;  %v530_v58 = vld [vmem:[%s1113_s2] ss:$0 sm:$0xff]  ;;  %v311_v62 = vld [vmem:[#allocation10] sm:$0xff]  ;;  %v314_v4 = vld [vmem:[#allocation10 + $0x18] sm:$0xff] }
  0x6a   :  { %677 = vmatpush1.bf16.msra.mxu0 %v676_v39  ;;  %v703_v2 = vpack.c.bf16 %v312_v63, %v311_v62  ;;  %v313_v3 = vld [vmem:[#allocation10 + $0x10] sm:$0xff]  ;;  %v315_v7 = vld [vmem:[#allocation10 + $0x20] sm:$0xff]  ;;  %v316_v8 = vld [vmem:[#allocation10 + $0x28] sm:$0xff] }
  0x6b   :  { %679 = vmatprep.subr.bf16.mxu0 %v678_v42  ;;  %v706_v6 = vpack.c.bf16 %v314_v4, %v313_v3  ;;  %v709_v9 = vpack.c.bf16 %v316_v8, %v315_v7  ;;  %v317_v10 = vld [vmem:[#allocation10 + $0x30] sm:$0xff]  ;;  %v318_v11 = vld [vmem:[#allocation10 + $0x38] sm:$0xff]  ;;  %v319_v13 = vld [vmem:[#allocation10 + $0x40] sm:$0xff] }
  0x6c   :  { %657 = vmatpush3.bf16.msra.mxu1 %v656_v15  ;;  %v712_v12 = vpack.c.bf16 %v318_v11, %v317_v10  ;;  %v320_v14 = vld [vmem:[#allocation10 + $0x48] sm:$0xff]  ;;  %v301_v16 = vld [vmem:[#allocation8 + $0xb8] sm:$0xff]  ;;  %v300_v19 = vld [vmem:[#allocation8 + $0xb0] sm:$0xff] }
  0x6d   :  { %658 = vmatprep.subr.bf16.mxu1 %v919_v1  ;;  %v715_v15 = vpack.c.bf16 %v320_v14, %v319_v13  ;;  %v321_v20 = vld [vmem:[#allocation10 + $0x50] sm:$0xff]  ;;  %v322_v22 = vld [vmem:[#allocation10 + $0x58] sm:$0xff]  ;;  %v302_v26 = vld [vmem:[#allocation8 + $0xc0] sm:$0xff] }
  0x6e   :  { %681 = vmatpush1.bf16.msra.mxu0 %v680_v45  ;;  %v718_v23 = vpack.c.bf16 %v322_v22, %v321_v20  ;;  %v305_v25 = vld [vmem:[#allocation8 + $0xd8] sm:$0xff]  ;;  %v304_v28 = vld [vmem:[#allocation8 + $0xd0] sm:$0xff]  ;;  %v323_v29 = vld [vmem:[#allocation10 + $0x60] sm:$0xff] }
  0x6f   :  { %683 = vmatprep.subr.bf16.mxu0 %v682_v48  ;;  %v324_v30 = vld [vmem:[#allocation10 + $0x68] sm:$0xff]  ;;  %v696_v31 = vpack.c.bf16 %v304_v28, %v302_v26  ;;  %v309_v34 = vld [vmem:[#allocation8 + $0xf8] sm:$0xff]  ;;  %v306_v35 = vld [vmem:[#allocation8 + $0xe0] sm:$0xff]  ;;  %v330_v48 = vshrl.u32 %v329_v47, 7 }
  0x70   :  { %660 = vmatpush3.bf16.msra.mxu1 %v659_v18  ;;  %v298_v18 = vld [vmem:[#allocation8 + $0xa0] sm:$0xff]  ;;  %v721_v32 = vpack.c.bf16 %v324_v30, %v323_v29  ;;  %v307_v33 = vld [vmem:[#allocation8 + $0xe8] sm:$0xff]  ;;  %v308_v37 = vld [vmem:[#allocation8 + $0xf0] sm:$0xff] }
  0x71   :  { %661 = vmatprep.subr.bf16.mxu1 %v919_v1  ;;  %v698_v36 = vpack.c.bf16 %v309_v34, %v307_v33  ;;  %v325_v38 = vld [vmem:[#allocation10 + $0x70] sm:$0xff]  ;;  %v326_v39 = vld [vmem:[#allocation10 + $0x78] sm:$0xff]  ;;  %v700_v40 = vpack.c.bf16 %v308_v37, %v306_v35  ;;  %v331_v49 = vsub.s32 0, %v330_v48  ;;  %v335_v50 = vsub.s32 1, %v330_v48 }
  0x72   :  { %685 = vmatpush1.bf16.msra.mxu0 %v684_v51  ;;  %v724_v41 = vpack.c.bf16 %v326_v39, %v325_v38  ;;  %v532_v42 = vld [vmem:[%s1115_s4] ss:$0 sm:$0xff]  ;;  %s920_s4 = smov [#allocation12]  }
  0x73   :  { %687 = vmatprep.subr.bf16.mxu0 %v686_v54  ;;  %v534_v52 = vld [vmem:[%s1119_s8] ss:$0 sm:$0xff]  ;;  %s515_s17 = sshll.u32 %s920_s4, 4  ;;  %s516_s17 = int_to_ptr.vmem [resolvable:$true] %s515_s17 }
  0x74   :  { %663 = vmatpush3.bf16.msra.mxu1 %v662_v21  ;;  %v692_v21 = vpack.c.bf16 %v300_v19, %v298_v18  ;;  %p859_p13 = scmp.lt.s32.totalorder %s516_s17, %s516_s17 }
  0x75   :  { %664 = vmatprep.subr.bf16.mxu1 %v919_v1 }
  0x76   :  { %689 = vmatpush1.bf16.msra.mxu0 %v688_v57 }
  0x78   :  { %666 = vmatpush3.bf16.msra.mxu1 %v665_v24  ;;  %v303_v24 = vld [vmem:[#allocation8 + $0xc8] sm:$0xff] }
  0x79   :  { %667 = vmatprep.subr.bf16.mxu1 %v919_v1 }
  0x7c   :  { %669 = vmatpush3.bf16.msra.mxu1 %v668_v27  ;;  %v694_v27 = vpack.c.bf16 %v305_v25, %v303_v24 }
  0x7d   :  { %702 = vmatprep.subr.bf16.mxu1 %v919_v1 }
 0x132   :  { %v179_v59 = vpop.f32.mrb[0].mxu0 }
 0x133   :  { %v180_v60 = vadd.f32 %v530_v58, %v179_v59  ;;  %v575_v61 = vpop.f32.mrb[1].mxu0 }
 0x135   :  { %740 = vtanh.f32 %v180_v60 }
 0x13f   :  { %v741_v5 = vpop.eup %740 }
 0x140   :  { %609 = vmatmul.mubr.f32.vlgmr.msra.gmra.mrb[0].mxu1 %v741_v5 }
 0x141   :  { %704 = vmatpush3.bf16.msra.mxu1 %v703_v2  ;;  %643 = vmatprep.mubr.msk.f32.mxu1 %vm918_vm0, %v917_v0  ;;  %v299_v0 = vld [vmem:[#allocation8 + $0xa8] sm:$0xff] }
 0x142   :  { %705 = vmatprep.subr.bf16.mxu1 %v919_v1  ;;  %v690_v17 = vpack.c.bf16 %v301_v16, %v299_v0 }
 0x144   :  { %691 = vmatprep.subr.bf16.mxu0 %v690_v17 }
 0x145   :  { %707 = vmatpush3.bf16.msra.mxu1 %v706_v6  ;;  %693 = vmatpush1.bf16.msra.mxu0 %v692_v21 }
 0x146   :  { %708 = vmatprep.subr.bf16.mxu1 %v919_v1  ;;  %695 = vmatprep.subr.bf16.mxu0 %v694_v27 }
 0x149   :  { %710 = vmatpush3.bf16.msra.mxu1 %v709_v9  ;;  %697 = vmatpush1.bf16.msra.mxu0 %v696_v31 }
 0x14a   :  { %711 = vmatprep.subr.bf16.mxu1 %v919_v1  ;;  %699 = vmatprep.subr.bf16.mxu0 %v698_v36 }
 0x14d   :  { %713 = vmatpush3.bf16.msra.mxu1 %v712_v12  ;;  %701 = vmatpush1.bf16.msra.mxu0 %v700_v40 }
 0x14e   :  { %714 = vmatprep.subr.bf16.mxu1 %v919_v1 }
 0x151   :  { %716 = vmatpush3.bf16.msra.mxu1 %v715_v15 }
 0x152   :  { %717 = vmatprep.subr.bf16.mxu1 %v919_v1 }
 0x155   :  { %719 = vmatpush3.bf16.msra.mxu1 %v718_v23 }
 0x156   :  { %720 = vmatprep.subr.bf16.mxu1 %v919_v1 }
 0x159   :  { %722 = vmatpush3.bf16.msra.mxu1 %v721_v32 }
 0x15a   :  { %723 = vmatprep.subr.bf16.mxu1 %v919_v1  ;;  %v310_v1 = vld [vmem:[%s1117_s6] sm:$0x3]  ;;  %s854_s6 = scalar_lea.vmem %s516_s17, 32 }
 0x15b   :  { %v332_v51 = vrot.slane %v310_v1, %v331_v49  ;;  %v336_v53 = vrot.slane %v310_v1, %v335_v50  ;;  %p855_p12 = scmp.ne.s32.totalorder %s516_s17, %s854_s6  ;;  %p860_p0 = scmp.lt.s32.totalorder %s854_s6, %s854_s6 }
 0x15d   :  { %725 = vmatpush3.bf16.msra.mxu1 %v724_v41  ;;  %p861_p1 = por %p860_p0, %p859_p13 }
 0x15f   :  { %p862_p2 = pnand %p861_p1, %p855_p12 }
 0x213   :  { %v273_v43 = vpop.f32.mrb[0].mxu1 }
 0x214   :  { %v274_v44 = vadd.f32 %v532_v42, %v273_v43  ;;  %v610_v45 = vpop.f32.mrb[1].mxu1 }
 0x216   :  { %742 = vtanh.f32 %v274_v44 }
 0x220   :  { %v743_v46 = vpop.eup %742 }
 0x221   :  { %404 = vmatmul.mubr.f32.vlgmr.msra.gmra.mrb[2].mxu0 %v743_v46  ;;  %644 = vmatmul.mubr.f32.vlgmr.msra.gmra.mrb[2].mxu1 %v743_v46 }
 0x2f4   :  { %v405_v54 = vpop.f32.mrb[2].mxu0  ;;  %v494_v55 = vpop.f32.mrb[2].mxu1 }
 0x2f5   :  { %v406_v56 = vadd.f32 %v405_v54, %v332_v51  ;;  %v495_v57 = vadd.f32 %v534_v52, %v494_v55  ;;  %v407_v58 = vpop.f32.mrb[3].mxu0  ;;  %v645_v59 = vpop.f32.mrb[3].mxu1 }
 0x2f6   :  { %v408_v60 = vadd.f32 %v407_v58, %v336_v53 }
 0x2f7   :  { %498 = vst [vmem:[#allocation12] sm:$0x3] %v495_v57 }
 0x2f8   :  { %v412_v61 = vcombine.low %v406_v56, %v408_v60 }
 0x2f9   :  { %865 = shalt.err (!%p862_p2)
}
 0x2fa   :  { %s866_s20 = scalar_lea.hbm %s1121_s10, 32 }
 0x2fb   :  { %p867_p3 = scmp.ne.s32.totalorder %s1121_s10, %s866_s20  ;;  %p870_p4 = scmp.lt.u32.totalorder %s866_s20, %s1121_s10 }
 0x2fd   :  { %p872_p5 = pnand %p870_p4, %p867_p3 }
 0x2ff   :  { %875 = shalt.err (!%p872_p5)
}
 0x300   :  { %518 = dma.vmem_to_hbm [thread:$0]  %s516_s17, 32, %s1121_s10, [#allocation13]   ;;  %533 = vst.sshfl [vmem:[#allocation11] sm:$0x33 pattern:$0x76325410] %v412_v61 }
 0x301   :  { %s876_s28 = scalar_lea.vmem %s506_s0, 64  ;;  %p881_p7 = scmp.lt.s32.totalorder %s506_s0, %s506_s0 }
 0x302   :  { %p877_p6 = scmp.ne.s32.totalorder %s506_s0, %s876_s28  ;;  %p882_p8 = scmp.lt.s32.totalorder %s876_s28, %s876_s28 }
 0x304   :  { %p883_p9 = por %p882_p8, %p881_p7 }
 0x306   :  { %p884_p10 = pnand %p883_p9, %p877_p6 }
 0x308   :  { %887 = shalt.err (!%p884_p10)
}
 0x309   :  { %s888_s16 = scalar_lea.hbm %s1120_s9, 64 }
 0x30a   :  { %p889_p11 = scmp.ne.s32.totalorder %s1120_s9, %s888_s16  ;;  %p892_p12 = scmp.lt.u32.totalorder %s888_s16, %s1120_s9 }
 0x30c   :  { %p894_p13 = pnand %p892_p12, %p889_p11 }
 0x30e   :  { %897 = shalt.err (!%p894_p13)
}
 0x30f   :  { %508 = dma.vmem_to_hbm [thread:$0]  %s506_s0, 64, %s1120_s9, [#allocation4]  }
 0x310   :  { %904 = dma.done.wait [#allocation4], 64  }
 0x311   :  { %905 = vsyncadd [#allocation4], 4294967232 }
 0x312   :  { %906 = dma.done.wait [#allocation13], 32  }
 0x313   :  { %907 = vsyncadd [#allocation13], 4294967264 }
 0x314   :  { %525 = vsyncpa [#allocation3], 1 }
 0x315   :  { %526 = vsyncpa [#allocation6], 1 }
 0x316   :  { %527 = vsyncpa [#allocation9], 1 }
 0x317   :  { %528 = vsyncpa [#allocation4], 1 }
 0x318   :  { %529 = vsyncpa [#allocation13], 1 }

</bundles_post_ra>
